<compile_context>
chip_gen: v6e
topology: v6e:2x2x1
jax: 0.10.0
libtpu: 0.0.40
codegen_flags: <defaults>
</compile_context>

<pallas_src>
import math

import jax
import jax.numpy as jnp
from jax.experimental import pallas as pl
from jax.experimental.pallas import tpu as pltpu


def _choose_q_tile(seq_q, seq_kv, num_heads, probs_itemsize=4,
                   budget_bytes=20 * 1024 * 1024):
    """Largest q-tile (multiple of 8, divides Sq) whose double-buffered
    probs + mask blocks fit inside the VMEM budget."""
    per_row = (num_heads * seq_kv * probs_itemsize + seq_kv * 4) * 2
    cap = max(8, budget_bytes // max(per_row, 1))
    if seq_q <= cap:
        return seq_q
    tile = (min(cap, seq_q) // 8) * 8
    while tile >= 8:
        if seq_q % tile == 0:
            return tile
        tile -= 8
    return seq_q  # fallback: no tiling


def _make_attn_kernel(num_heads: int, head_dim: int, has_mask: bool):
    scale = 1.0 / math.sqrt(head_dim)

    def body(q_ref, k_ref, v_ref, mask_ref, out_ref, probs_ref):
        # q_ref:       (1, tq,  H)     out_ref:   (1, tq, H)
        # k_ref/v_ref: (1, Skv, H)     probs_ref: (1, nH, tq, Skv)
        # mask_ref:    (1, 1, tq, Skv) f32 (only when has_mask)
        mask = mask_ref[0, 0] if has_mask else None  # load once, reuse per head

        for h in range(num_heads):  # static unrolled loop -> static lane slices
            lo = h * head_dim
            # fold 1/sqrt(D) into q (tq*D elements instead of tq*Skv)
            q = q_ref[0, :, pl.ds(lo, head_dim)] * scale      # (tq, D) input dtype
            k = k_ref[0, :, pl.ds(lo, head_dim)]              # (Skv, D)
            v = v_ref[0, :, pl.ds(lo, head_dim)]              # (Skv, D)

            # scores = q @ k^T: contract over D, f32 accumulation, no k.T copy
            s = jax.lax.dot_general(
                q, k, (((1,), (1,)), ((), ())),
                preferred_element_type=jnp.float32)           # (tq, Skv) f32
            if has_mask:
                s = s + mask

            # numerically-stable softmax along the kv axis (f32)
            s_max = jnp.max(s, axis=-1, keepdims=True)
            e = jnp.exp(s - s_max)
            denom = jnp.sum(e, axis=-1, keepdims=True)
            p = e * pl.reciprocal(denom, approx=True)

            probs_ref[0, h] = p.astype(probs_ref.dtype)

            # PV matmul with operands in the input dtype (bf16-native MXU path)
            pv = jax.lax.dot_general(
                p.astype(v.dtype), v, (((1,), (0,)), ((), ())),
                preferred_element_type=jnp.float32)           # (tq, D) f32

            # static lane-slice store into the resident lane-dense (tq, H) slab
            out_ref[0, :, pl.ds(lo, head_dim)] = pv.astype(out_ref.dtype)

    if has_mask:
        return body

    def body_no_mask(q_ref, k_ref, v_ref, out_ref, probs_ref):
        body(q_ref, k_ref, v_ref, None, out_ref, probs_ref)

    return body_no_mask


def simple_attention_core(query, key, value, attention_mask, num_heads: int):
    """Pallas implementation of SimpleAttentionCore.forward.

    query : [B, Sq, H]
    key   : [B, Skv, H]
    value : [B, Skv, H]
    attention_mask : additive mask broadcastable to [B, 1, Sq, Skv], or None
    returns (outputs [B, Sq, H], probs [B, num_heads, Sq, Skv])
    """
    B, Sq, H = query.shape
    _, Skv, _ = key.shape
    assert H % num_heads == 0
    D = H // num_heads
    has_mask = attention_mask is not None

    probs_dtype = query.dtype
    tq = _choose_q_tile(Sq, Skv, num_heads,
                        probs_itemsize=jnp.dtype(probs_dtype).itemsize)
    assert Sq % tq == 0
    n_q = Sq // tq

    kernel = _make_attn_kernel(num_heads, D, has_mask)

    # No reshape / transpose of q/k/v: head split happens inside the kernel.
    in_specs = [
        pl.BlockSpec((1, tq, H), lambda b, qi: (b, qi, 0)),    # q tile
        pl.BlockSpec((1, Skv, H), lambda b, qi: (b, 0, 0)),    # K resident over qi
        pl.BlockSpec((1, Skv, H), lambda b, qi: (b, 0, 0)),    # V resident over qi
    ]
    inputs = [query, key, value]
    if has_mask:
        # keep mask f32 end-to-end (precision of -1e4 biases under bf16 inputs)
        mask = jnp.broadcast_to(attention_mask,
                                (B, 1, Sq, Skv)).astype(jnp.float32)
        in_specs.append(pl.BlockSpec((1, 1, tq, Skv), lambda b, qi: (b, 0, qi, 0)))
        inputs.append(mask)

    out_specs = [
        # lane-dense output slab, written directly as [B, Sq, H] (no transpose)
        pl.BlockSpec((1, tq, H), lambda b, qi: (b, qi, 0)),
        pl.BlockSpec((1, num_heads, tq, Skv), lambda b, qi: (b, 0, qi, 0)),
    ]
    out_shape = (
        jax.ShapeDtypeStruct((B, Sq, H), query.dtype),
        jax.ShapeDtypeStruct((B, num_heads, Sq, Skv), probs_dtype),
    )

    outputs, probs = pl.pallas_call(
        kernel,
        out_shape=out_shape,
        grid_spec=pltpu.PrefetchScalarGridSpec(
            num_scalar_prefetch=0,
            grid=(B, n_q),
            in_specs=in_specs,
            out_specs=out_specs,
        ),
        compiler_params=pltpu.CompilerParams(
            dimension_semantics=("parallel", "parallel"),
            vmem_limit_bytes=48 * 1024 * 1024,
        ),
    )(*inputs)

    return outputs, probs


def _reference(query, key, value, attention_mask, num_heads):
    B, Sq, H = query.shape
    _, Skv, _ = key.shape
    D = H // num_heads
    q = query.reshape(B, Sq, num_heads, D).transpose(0, 2, 1, 3)
    k = key.reshape(B, Skv, num_heads, D).transpose(0, 2, 1, 3)
    v = value.reshape(B, Skv, num_heads, D).transpose(0, 2, 1, 3)
    scores = jnp.einsum("bhqd,bhkd->bhqk", q, k) / math.sqrt(D)
    if attention_mask is not None:
        scores = scores + attention_mask
    probs = jax.nn.softmax(scores, axis=-1)
    out = jnp.einsum("bhqk,bhkd->bhqd", probs, v)
    out = out.transpose(0, 2, 1, 3).reshape(B, Sq, H)
    return out, probs


if __name__ == "__main__":
    B, Sq, Skv, H, NH = 2, 8, 8, 32, 4

    key_rng = jax.random.PRNGKey(0)
    kq, kk, kv, km = jax.random.split(key_rng, 4)
    query = jax.random.normal(kq, (B, Sq, H), dtype=jnp.float32)
    key_t = jax.random.normal(kk, (B, Skv, H), dtype=jnp.float32)
    value = jax.random.normal(kv, (B, Skv, H), dtype=jnp.float32)
    # additive attention mask, broadcast over heads
    attention_mask = (
        jax.random.bernoulli(km, 0.8, (B, 1, Sq, Skv)).astype(jnp.float32) - 1.0
    ) * 1e4

    # --- masked path ---
    outputs, probs = simple_attention_core(query, key_t, value, attention_mask, NH)
    outputs = jax.block_until_ready(outputs)
    probs = jax.block_until_ready(probs)

    ref_out, ref_probs = _reference(query, key_t, value, attention_mask, NH)
    assert outputs.shape == (B, Sq, H)
    assert probs.shape == (B, NH, Sq, Skv)
    # tolerance accounts for pl.reciprocal(approx=True) in the softmax denom
    assert jnp.allclose(outputs, ref_out, atol=3e-3, rtol=3e-3)
    assert jnp.allclose(probs, ref_probs, atol=3e-3, rtol=3e-3)

    # --- no-mask path (specialized pallas_call without a mask operand) ---
    outputs_nm, probs_nm = simple_attention_core(query, key_t, value, None, NH)
    outputs_nm = jax.block_until_ready(outputs_nm)
    probs_nm = jax.block_until_ready(probs_nm)
    ref_out_nm, ref_probs_nm = _reference(query, key_t, value, None, NH)
    assert jnp.allclose(outputs_nm, ref_out_nm, atol=3e-3, rtol=3e-3)
    assert jnp.allclose(probs_nm, ref_probs_nm, atol=3e-3, rtol=3e-3)

    print("KERNEL_OK")
</pallas_src>

<mosaic_0001>
module attributes {stable_mosaic.version = 11 : i64} {
  func.func @body(%arg0: i32, %arg1: i32, %arg2: memref<1x8x32xf32, #tpu.memory_space<vmem>>, %arg3: memref<1x8x32xf32, #tpu.memory_space<vmem>>, %arg4: memref<1x8x32xf32, #tpu.memory_space<vmem>>, %arg5: memref<1x1x8x8xf32, #tpu.memory_space<vmem>>, %arg6: memref<1x8x32xf32, #tpu.memory_space<vmem>>, %arg7: memref<1x4x8x8xf32, #tpu.memory_space<vmem>>) attributes {dimension_semantics = [#tpu.dimension_semantics<parallel>, #tpu.dimension_semantics<parallel>], iteration_bounds = array<i64: 2, 1>, scalar_prefetch = 0 : i64, scratch_operands = 0 : i64, tpu.core_type = #tpu.core_type<tc>, window_params = [{transform_indices = @transform_0, window_bounds = array<i64: 1, 8, 32>}, {transform_indices = @transform_1, window_bounds = array<i64: 1, 8, 32>}, {transform_indices = @transform_2, window_bounds = array<i64: 1, 8, 32>}, {transform_indices = @transform_3, window_bounds = array<i64: 1, 1, 8, 8>}, {transform_indices = @transform_4, window_bounds = array<i64: 1, 8, 32>}, {transform_indices = @transform_5, window_bounds = array<i64: 1, 4, 8, 8>}]} {
    %c0 = arith.constant 0 : index
    %c0_0 = arith.constant 0 : index
    %c0_1 = arith.constant 0 : index
    %c0_2 = arith.constant 0 : index
    %0 = vector.load %arg5[%c0, %c0_0, %c0_1, %c0_2] : memref<1x1x8x8xf32, #tpu.memory_space<vmem>>, vector<1x1x8x8xf32>
    %1 = vector.shape_cast %0 : vector<1x1x8x8xf32> to vector<8x8xf32>
    %c0_3 = arith.constant 0 : index
    %c0_4 = arith.constant 0 : index
    %c0_5 = arith.constant 0 : index
    %2 = vector.load %arg2[%c0_3, %c0_4, %c0_5] : memref<1x8x32xf32, #tpu.memory_space<vmem>>, vector<1x8x8xf32>
    %3 = vector.shape_cast %2 : vector<1x8x8xf32> to vector<8x8xf32>
    %cst = arith.constant 0.353553385 : f32
    %4 = vector.broadcast %cst : f32 to vector<8x8xf32>
    %5 = arith.mulf %3, %4 : vector<8x8xf32>
    %c0_6 = arith.constant 0 : index
    %c0_7 = arith.constant 0 : index
    %c0_8 = arith.constant 0 : index
    %6 = vector.load %arg3[%c0_6, %c0_7, %c0_8] : memref<1x8x32xf32, #tpu.memory_space<vmem>>, vector<1x8x8xf32>
    %7 = vector.shape_cast %6 : vector<1x8x8xf32> to vector<8x8xf32>
    %c0_9 = arith.constant 0 : index
    %c0_10 = arith.constant 0 : index
    %c0_11 = arith.constant 0 : index
    %8 = vector.load %arg4[%c0_9, %c0_10, %c0_11] : memref<1x8x32xf32, #tpu.memory_space<vmem>>, vector<1x8x8xf32>
    %9 = vector.shape_cast %8 : vector<1x8x8xf32> to vector<8x8xf32>
    %cst_12 = arith.constant dense<0.000000e+00> : vector<8x8xf32>
    %10 = tpu.matmul %5, %7, %cst_12 {dimension_numbers = #tpu.dot_dimension_numbers<[1], [1], [0], [0], [0, 0, 1, 0], [], []>} : vector<8x8xf32>, vector<8x8xf32>, vector<8x8xf32> -> vector<8x8xf32>
    %11 = arith.addf %10, %1 : vector<8x8xf32>
    %cst_13 = arith.constant dense<0xFF800000> : vector<8xf32>
    %12 = vector.multi_reduction <maximumf>, %11, %cst_13 [1] : vector<8x8xf32> to vector<8xf32>
    %13 = vector.shape_cast %12 : vector<8xf32> to vector<8x1xf32>
    %14 = vector.broadcast %13 : vector<8x1xf32> to vector<8x8xf32>
    %15 = arith.subf %11, %14 : vector<8x8xf32>
    %16 = math.exp %15 : vector<8x8xf32>
    %cst_14 = arith.constant dense<0.000000e+00> : vector<8xf32>
    %17 = vector.multi_reduction <add>, %16, %cst_14 [1] : vector<8x8xf32> to vector<8xf32>
    %18 = vector.shape_cast %17 : vector<8xf32> to vector<8x1xf32>
    %19 = tpu.reciprocal %18 {approx = true} : vector<8x1xf32> -> vector<8x1xf32>
    %20 = vector.broadcast %19 : vector<8x1xf32> to vector<8x8xf32>
    %21 = arith.mulf %16, %20 : vector<8x8xf32>
    %c0_15 = arith.constant 0 : index
    %c0_16 = arith.constant 0 : index
    %c0_17 = arith.constant 0 : index
    %c0_18 = arith.constant 0 : index
    %22 = vector.load %arg7[%c0_15, %c0_16, %c0_17, %c0_18] : memref<1x4x8x8xf32, #tpu.memory_space<vmem>>, vector<1x1x8x8xf32>
    %23 = vector.shape_cast %22 : vector<1x1x8x8xf32> to vector<8x8xf32>
    %24 = vector.shape_cast %21 : vector<8x8xf32> to vector<1x1x8x8xf32>
    tpu.vector_store %arg7[%c0_15, %c0_16, %c0_17, %c0_18], %24 {strides = array<i32>} : memref<1x4x8x8xf32, #tpu.memory_space<vmem>>, vector<1x1x8x8xf32>,
    %cst_19 = arith.constant dense<0.000000e+00> : vector<8x8xf32>
    %25 = tpu.matmul %21, %9, %cst_19 {dimension_numbers = #tpu.dot_dimension_numbers<[1], [0], [0], [1], [0, 0, 1, 1], [], []>} : vector<8x8xf32>, vector<8x8xf32>, vector<8x8xf32> -> vector<8x8xf32>
    %c0_20 = arith.constant 0 : index
    %c0_21 = arith.constant 0 : index
    %c0_22 = arith.constant 0 : index
    %26 = vector.load %arg6[%c0_20, %c0_21, %c0_22] : memref<1x8x32xf32, #tpu.memory_space<vmem>>, vector<1x8x8xf32>
    %27 = vector.shape_cast %26 : vector<1x8x8xf32> to vector<8x8xf32>
    %28 = vector.shape_cast %25 : vector<8x8xf32> to vector<1x8x8xf32>
    tpu.vector_store %arg6[%c0_20, %c0_21, %c0_22], %28 {strides = array<i32>} : memref<1x8x32xf32, #tpu.memory_space<vmem>>, vector<1x8x8xf32>,
    %c0_23 = arith.constant 0 : index
    %c0_24 = arith.constant 0 : index
    %c8 = arith.constant 8 : index
    %29 = vector.load %arg2[%c0_23, %c0_24, %c8] : memref<1x8x32xf32, #tpu.memory_space<vmem>>, vector<1x8x8xf32>
    %30 = vector.shape_cast %29 : vector<1x8x8xf32> to vector<8x8xf32>
    %cst_25 = arith.constant 0.353553385 : f32
    %31 = vector.broadcast %cst_25 : f32 to vector<8x8xf32>
    %32 = arith.mulf %30, %31 : vector<8x8xf32>
    %c0_26 = arith.constant 0 : index
    %c0_27 = arith.constant 0 : index
    %c8_28 = arith.constant 8 : index
    %33 = vector.load %arg3[%c0_26, %c0_27, %c8_28] : memref<1x8x32xf32, #tpu.memory_space<vmem>>, vector<1x8x8xf32>
    %34 = vector.shape_cast %33 : vector<1x8x8xf32> to vector<8x8xf32>
    %c0_29 = arith.constant 0 : index
    %c0_30 = arith.constant 0 : index
    %c8_31 = arith.constant 8 : index
    %35 = vector.load %arg4[%c0_29, %c0_30, %c8_31] : memref<1x8x32xf32, #tpu.memory_space<vmem>>, vector<1x8x8xf32>
    %36 = vector.shape_cast %35 : vector<1x8x8xf32> to vector<8x8xf32>
    %cst_32 = arith.constant dense<0.000000e+00> : vector<8x8xf32>
    %37 = tpu.matmul %32, %34, %cst_32 {dimension_numbers = #tpu.dot_dimension_numbers<[1], [1], [0], [0], [0, 0, 1, 0], [], []>} : vector<8x8xf32>, vector<8x8xf32>, vector<8x8xf32> -> vector<8x8xf32>
    %38 = arith.addf %37, %1 : vector<8x8xf32>
    %cst_33 = arith.constant dense<0xFF800000> : vector<8xf32>
    %39 = vector.multi_reduction <maximumf>, %38, %cst_33 [1] : vector<8x8xf32> to vector<8xf32>
    %40 = vector.shape_cast %39 : vector<8xf32> to vector<8x1xf32>
    %41 = vector.broadcast %40 : vector<8x1xf32> to vector<8x8xf32>
    %42 = arith.subf %38, %41 : vector<8x8xf32>
    %43 = math.exp %42 : vector<8x8xf32>
    %cst_34 = arith.constant dense<0.000000e+00> : vector<8xf32>
    %44 = vector.multi_reduction <add>, %43, %cst_34 [1] : vector<8x8xf32> to vector<8xf32>
    %45 = vector.shape_cast %44 : vector<8xf32> to vector<8x1xf32>
    %46 = tpu.reciprocal %45 {approx = true} : vector<8x1xf32> -> vector<8x1xf32>
    %47 = vector.broadcast %46 : vector<8x1xf32> to vector<8x8xf32>
    %48 = arith.mulf %43, %47 : vector<8x8xf32>
    %c0_35 = arith.constant 0 : index
    %c1 = arith.constant 1 : index
    %c0_36 = arith.constant 0 : index
    %c0_37 = arith.constant 0 : index
    %49 = vector.load %arg7[%c0_35, %c1, %c0_36, %c0_37] : memref<1x4x8x8xf32, #tpu.memory_space<vmem>>, vector<1x1x8x8xf32>
    %50 = vector.shape_cast %49 : vector<1x1x8x8xf32> to vector<8x8xf32>
    %51 = vector.shape_cast %48 : vector<8x8xf32> to vector<1x1x8x8xf32>
    tpu.vector_store %arg7[%c0_35, %c1, %c0_36, %c0_37], %51 {strides = array<i32>} : memref<1x4x8x8xf32, #tpu.memory_space<vmem>>, vector<1x1x8x8xf32>,
    %cst_38 = arith.constant dense<0.000000e+00> : vector<8x8xf32>
    %52 = tpu.matmul %48, %36, %cst_38 {dimension_numbers = #tpu.dot_dimension_numbers<[1], [0], [0], [1], [0, 0, 1, 1], [], []>} : vector<8x8xf32>, vector<8x8xf32>, vector<8x8xf32> -> vector<8x8xf32>
    %c0_39 = arith.constant 0 : index
    %c0_40 = arith.constant 0 : index
    %c8_41 = arith.constant 8 : index
    %53 = vector.load %arg6[%c0_39, %c0_40, %c8_41] : memref<1x8x32xf32, #tpu.memory_space<vmem>>, vector<1x8x8xf32>
    %54 = vector.shape_cast %53 : vector<1x8x8xf32> to vector<8x8xf32>
    %55 = vector.shape_cast %52 : vector<8x8xf32> to vector<1x8x8xf32>
    tpu.vector_store %arg6[%c0_39, %c0_40, %c8_41], %55 {strides = array<i32>} : memref<1x8x32xf32, #tpu.memory_space<vmem>>, vector<1x8x8xf32>,
    %c0_42 = arith.constant 0 : index
    %c0_43 = arith.constant 0 : index
    %c16 = arith.constant 16 : index
    %56 = vector.load %arg2[%c0_42, %c0_43, %c16] : memref<1x8x32xf32, #tpu.memory_space<vmem>>, vector<1x8x8xf32>
    %57 = vector.shape_cast %56 : vector<1x8x8xf32> to vector<8x8xf32>
    %cst_44 = arith.constant 0.353553385 : f32
    %58 = vector.broadcast %cst_44 : f32 to vector<8x8xf32>
    %59 = arith.mulf %57, %58 : vector<8x8xf32>
    %c0_45 = arith.constant 0 : index
    %c0_46 = arith.constant 0 : index
    %c16_47 = arith.constant 16 : index
    %60 = vector.load %arg3[%c0_45, %c0_46, %c16_47] : memref<1x8x32xf32, #tpu.memory_space<vmem>>, vector<1x8x8xf32>
    %61 = vector.shape_cast %60 : vector<1x8x8xf32> to vector<8x8xf32>
    %c0_48 = arith.constant 0 : index
    %c0_49 = arith.constant 0 : index
    %c16_50 = arith.constant 16 : index
    %62 = vector.load %arg4[%c0_48, %c0_49, %c16_50] : memref<1x8x32xf32, #tpu.memory_space<vmem>>, vector<1x8x8xf32>
    %63 = vector.shape_cast %62 : vector<1x8x8xf32> to vector<8x8xf32>
    %cst_51 = arith.constant dense<0.000000e+00> : vector<8x8xf32>
    %64 = tpu.matmul %59, %61, %cst_51 {dimension_numbers = #tpu.dot_dimension_numbers<[1], [1], [0], [0], [0, 0, 1, 0], [], []>} : vector<8x8xf32>, vector<8x8xf32>, vector<8x8xf32> -> vector<8x8xf32>
    %65 = arith.addf %64, %1 : vector<8x8xf32>
    %cst_52 = arith.constant dense<0xFF800000> : vector<8xf32>
    %66 = vector.multi_reduction <maximumf>, %65, %cst_52 [1] : vector<8x8xf32> to vector<8xf32>
    %67 = vector.shape_cast %66 : vector<8xf32> to vector<8x1xf32>
    %68 = vector.broadcast %67 : vector<8x1xf32> to vector<8x8xf32>
    %69 = arith.subf %65, %68 : vector<8x8xf32>
    %70 = math.exp %69 : vector<8x8xf32>
    %cst_53 = arith.constant dense<0.000000e+00> : vector<8xf32>
    %71 = vector.multi_reduction <add>, %70, %cst_53 [1] : vector<8x8xf32> to vector<8xf32>
    %72 = vector.shape_cast %71 : vector<8xf32> to vector<8x1xf32>
    %73 = tpu.reciprocal %72 {approx = true} : vector<8x1xf32> -> vector<8x1xf32>
    %74 = vector.broadcast %73 : vector<8x1xf32> to vector<8x8xf32>
    %75 = arith.mulf %70, %74 : vector<8x8xf32>
    %c0_54 = arith.constant 0 : index
    %c2 = arith.constant 2 : index
    %c0_55 = arith.constant 0 : index
    %c0_56 = arith.constant 0 : index
    %76 = vector.load %arg7[%c0_54, %c2, %c0_55, %c0_56] : memref<1x4x8x8xf32, #tpu.memory_space<vmem>>, vector<1x1x8x8xf32>
    %77 = vector.shape_cast %76 : vector<1x1x8x8xf32> to vector<8x8xf32>
    %78 = vector.shape_cast %75 : vector<8x8xf32> to vector<1x1x8x8xf32>
    tpu.vector_store %arg7[%c0_54, %c2, %c0_55, %c0_56], %78 {strides = array<i32>} : memref<1x4x8x8xf32, #tpu.memory_space<vmem>>, vector<1x1x8x8xf32>,
    %cst_57 = arith.constant dense<0.000000e+00> : vector<8x8xf32>
    %79 = tpu.matmul %75, %63, %cst_57 {dimension_numbers = #tpu.dot_dimension_numbers<[1], [0], [0], [1], [0, 0, 1, 1], [], []>} : vector<8x8xf32>, vector<8x8xf32>, vector<8x8xf32> -> vector<8x8xf32>
    %c0_58 = arith.constant 0 : index
    %c0_59 = arith.constant 0 : index
    %c16_60 = arith.constant 16 : index
    %80 = vector.load %arg6[%c0_58, %c0_59, %c16_60] : memref<1x8x32xf32, #tpu.memory_space<vmem>>, vector<1x8x8xf32>
    %81 = vector.shape_cast %80 : vector<1x8x8xf32> to vector<8x8xf32>
    %82 = vector.shape_cast %79 : vector<8x8xf32> to vector<1x8x8xf32>
    tpu.vector_store %arg6[%c0_58, %c0_59, %c16_60], %82 {strides = array<i32>} : memref<1x8x32xf32, #tpu.memory_space<vmem>>, vector<1x8x8xf32>,
    %c0_61 = arith.constant 0 : index
    %c0_62 = arith.constant 0 : index
    %c24 = arith.constant 24 : index
    %83 = vector.load %arg2[%c0_61, %c0_62, %c24] : memref<1x8x32xf32, #tpu.memory_space<vmem>>, vector<1x8x8xf32>
    %84 = vector.shape_cast %83 : vector<1x8x8xf32> to vector<8x8xf32>
    %cst_63 = arith.constant 0.353553385 : f32
    %85 = vector.broadcast %cst_63 : f32 to vector<8x8xf32>
    %86 = arith.mulf %84, %85 : vector<8x8xf32>
    %c0_64 = arith.constant 0 : index
    %c0_65 = arith.constant 0 : index
    %c24_66 = arith.constant 24 : index
    %87 = vector.load %arg3[%c0_64, %c0_65, %c24_66] : memref<1x8x32xf32, #tpu.memory_space<vmem>>, vector<1x8x8xf32>
    %88 = vector.shape_cast %87 : vector<1x8x8xf32> to vector<8x8xf32>
    %c0_67 = arith.constant 0 : index
    %c0_68 = arith.constant 0 : index
    %c24_69 = arith.constant 24 : index
    %89 = vector.load %arg4[%c0_67, %c0_68, %c24_69] : memref<1x8x32xf32, #tpu.memory_space<vmem>>, vector<1x8x8xf32>
    %90 = vector.shape_cast %89 : vector<1x8x8xf32> to vector<8x8xf32>
    %cst_70 = arith.constant dense<0.000000e+00> : vector<8x8xf32>
    %91 = tpu.matmul %86, %88, %cst_70 {dimension_numbers = #tpu.dot_dimension_numbers<[1], [1], [0], [0], [0, 0, 1, 0], [], []>} : vector<8x8xf32>, vector<8x8xf32>, vector<8x8xf32> -> vector<8x8xf32>
    %92 = arith.addf %91, %1 : vector<8x8xf32>
    %cst_71 = arith.constant dense<0xFF800000> : vector<8xf32>
    %93 = vector.multi_reduction <maximumf>, %92, %cst_71 [1] : vector<8x8xf32> to vector<8xf32>
    %94 = vector.shape_cast %93 : vector<8xf32> to vector<8x1xf32>
    %95 = vector.broadcast %94 : vector<8x1xf32> to vector<8x8xf32>
    %96 = arith.subf %92, %95 : vector<8x8xf32>
    %97 = math.exp %96 : vector<8x8xf32>
    %cst_72 = arith.constant dense<0.000000e+00> : vector<8xf32>
    %98 = vector.multi_reduction <add>, %97, %cst_72 [1] : vector<8x8xf32> to vector<8xf32>
    %99 = vector.shape_cast %98 : vector<8xf32> to vector<8x1xf32>
    %100 = tpu.reciprocal %99 {approx = true} : vector<8x1xf32> -> vector<8x1xf32>
    %101 = vector.broadcast %100 : vector<8x1xf32> to vector<8x8xf32>
    %102 = arith.mulf %97, %101 : vector<8x8xf32>
    %c0_73 = arith.constant 0 : index
    %c3 = arith.constant 3 : index
    %c0_74 = arith.constant 0 : index
    %c0_75 = arith.constant 0 : index
    %103 = vector.load %arg7[%c0_73, %c3, %c0_74, %c0_75] : memref<1x4x8x8xf32, #tpu.memory_space<vmem>>, vector<1x1x8x8xf32>
    %104 = vector.shape_cast %103 : vector<1x1x8x8xf32> to vector<8x8xf32>
    %105 = vector.shape_cast %102 : vector<8x8xf32> to vector<1x1x8x8xf32>
    tpu.vector_store %arg7[%c0_73, %c3, %c0_74, %c0_75], %105 {strides = array<i32>} : memref<1x4x8x8xf32, #tpu.memory_space<vmem>>, vector<1x1x8x8xf32>,
    %cst_76 = arith.constant dense<0.000000e+00> : vector<8x8xf32>
    %106 = tpu.matmul %102, %90, %cst_76 {dimension_numbers = #tpu.dot_dimension_numbers<[1], [0], [0], [1], [0, 0, 1, 1], [], []>} : vector<8x8xf32>, vector<8x8xf32>, vector<8x8xf32> -> vector<8x8xf32>
    %c0_77 = arith.constant 0 : index
    %c0_78 = arith.constant 0 : index
    %c24_79 = arith.constant 24 : index
    %107 = vector.load %arg6[%c0_77, %c0_78, %c24_79] : memref<1x8x32xf32, #tpu.memory_space<vmem>>, vector<1x8x8xf32>
    %108 = vector.shape_cast %107 : vector<1x8x8xf32> to vector<8x8xf32>
    %109 = vector.shape_cast %106 : vector<8x8xf32> to vector<1x8x8xf32>
    tpu.vector_store %arg6[%c0_77, %c0_78, %c24_79], %109 {strides = array<i32>} : memref<1x8x32xf32, #tpu.memory_space<vmem>>, vector<1x8x8xf32>,
    return
  }
  func.func @transform_0(%arg0: i32, %arg1: i32) -> (i32, i32, i32) {
    %c0_i32 = arith.constant 0 : i32
    %c0_i32_0 = arith.constant 0 : i32
    return %arg0, %arg1, %c0_i32 : i32, i32, i32
  }
  func.func @transform_1(%arg0: i32, %arg1: i32) -> (i32, i32, i32) {
    %c0_i32 = arith.constant 0 : i32
    %c0_i32_0 = arith.constant 0 : i32
    %c0_i32_1 = arith.constant 0 : i32
    return %arg0, %c0_i32, %c0_i32_0 : i32, i32, i32
  }
  func.func @transform_2(%arg0: i32, %arg1: i32) -> (i32, i32, i32) {
    %c0_i32 = arith.constant 0 : i32
    %c0_i32_0 = arith.constant 0 : i32
    %c0_i32_1 = arith.constant 0 : i32
    return %arg0, %c0_i32, %c0_i32_0 : i32, i32, i32
  }
  func.func @transform_3(%arg0: i32, %arg1: i32) -> (i32, i32, i32, i32) {
    %c0_i32 = arith.constant 0 : i32
    %c0_i32_0 = arith.constant 0 : i32
    %c0_i32_1 = arith.constant 0 : i32
    return %arg0, %c0_i32, %arg1, %c0_i32_0 : i32, i32, i32, i32
  }
  func.func @transform_4(%arg0: i32, %arg1: i32) -> (i32, i32, i32) {
    %c0_i32 = arith.constant 0 : i32
    %c0_i32_0 = arith.constant 0 : i32
    return %arg0, %arg1, %c0_i32 : i32, i32, i32
  }
  func.func @transform_5(%arg0: i32, %arg1: i32) -> (i32, i32, i32, i32) {
    %c0_i32 = arith.constant 0 : i32
    %c0_i32_0 = arith.constant 0 : i32
    %c0_i32_1 = arith.constant 0 : i32
    return %arg0, %c0_i32, %arg1, %c0_i32_0 : i32, i32, i32, i32
  }
}

</mosaic_0001>

<bundles_post_ra>
// kernel: tpu_custom_call.1
= control target key start
LH: loop header
LB: loop body
LE: loop exit
PB: predicated region body
PF: predicated region fallthrough
CT: control target
= control target key end

     0   :  { %s2130_s0 = inlined_call_operand.hbm [shape: f32[2,8,32], index: 0, kind: input, shape index: {}]   ;;  %s2131_s1 = inlined_call_operand.hbm [shape: f32[2,8,32], index: 1, kind: input, shape index: {}]   ;;  %s2132_s2 = inlined_call_operand.hbm [shape: f32[2,8,32], index: 2, kind: input, shape index: {}]   ;;  %s2133_s3 = inlined_call_operand.hbm [shape: f32[2,1,8,8], index: 3, kind: input, shape index: {}]   ;;  %s2134_s4 = inlined_call_operand.hbm [shape: f32[2,8,32], index: 4, kind: output, shape index: {0}]   ;;  %s2135_s5 = inlined_call_operand.hbm [shape: f32[2,4,8,8], index: 5, kind: output, shape index: {1}]  }
   0x1   :  { %2141 = sst [smem:[#allocation23_spill]] %s2131_s1 }
   0x2   :  { %11 = vsyncpa [#allocation3], 0 }
   0x3   :  { %13 = vsyncpa [#allocation3 + $0x1], 0 }
   0x4   :  { %14 = vsyncpa [#allocation6], 0 }
   0x5   :  { %16 = vsyncpa [#allocation6 + $0x1], 0 }
   0x6   :  { %17 = vsyncpa [#allocation9], 0 }
   0x7   :  { %19 = vsyncpa [#allocation9 + $0x1], 0 }
   0x8   :  { %20 = vsyncpa [#allocation4], 0 }
   0x9   :  { %22 = vsyncpa [#allocation4 + $0x1], 0 }
   0xa   :  { %23 = vsyncpa [#allocation12], 0 }
   0xb   :  { %25 = vsyncpa [#allocation12 + $0x1], 0  ;;  %s1789_s18 = smov 0   ;;  %s1791_s19 = smov 0  }
   0xc   :  { %s1793_s20 = smov 0   ;;  %s1795_s21 = smov 0  }
   0xd   :  { %s1797_s22 = smov 0   ;;  %s1799_s23 = smov 0  }
   0xe LB: > { %2142 = sst [smem:[#allocation18_spill]] %s1730_s20  ;;  %s1820_s24 = sadd.s32 4294967295, %s1742_s23   ;;  %s1742_s23 = sphi %s1799_s23, %s31_s23   ;;  %s1738_s22 = sphi %s1797_s22, %s2159_s22   ;;  %s1734_s21 = sphi %s1795_s21, %s2158_s21   ;;  %s1730_s20 = sphi %s1793_s20, %s2157_s20   ;;  %s1726_s19 = sphi %s1791_s19, %s2161_s19   ;;  %s1722_s18 = sphi %s1789_s18, %s2160_s18  }
   0xf   : > { %2143 = sst [smem:[#allocation19_spill]] %s1738_s22  ;;  %s1308_s25 = sadd.s32 4294967294, %s1742_s23  }
  0x10   : > { %2144 = sst [smem:[#allocation20_spill]] %s1742_s23  ;;  %s43_s26 = sadd.s32 1, %s1738_s22 }
  0x11   : > { %s52_s27 = sadd.s32 1, %s1730_s20  ;;  %p45_p0 = scmp.ge.s32.totalorder %s43_s26, 2 }
  0x12   : > { %p59_p1 = scmp.ne.s32.totalorder %s1730_s20, %s1726_s19  ;;  %p60_p2 = scmp.eq.s32.totalorder %s1742_s23, 0 }
  0x13   : > { %p65_p3 = scmp.ne.s32.totalorder %s1726_s19, %s1722_s18  ;;  %s2163_s26 = smov (%p45_p0, %s43_s26), 0 }
  0x14   : > { %2145 = sst [smem:[#allocation21_spill]] %s2163_s26  ;;  %p1832_p4 = por %p60_p2, %p59_p1 }
  0x15   : > { %p66_p5 = scmp.eq.s32.totalorder %s1820_s24, 0  ;;  %s47_s29 = ssub.s32 %s1738_s22, %s2163_s26 }
  0x16   : > { %p171_p6 = scmp.eq.s32.totalorder %s1820_s24, 1  ;;  %p50_p7 = scmp.eq.s32.totalorder %s47_s29, 0 }
  0x17   : > { %p1840_p8 = por %p66_p5, %p65_p3  ;;  %p177_p10 = scmp.eq.s32.totalorder %s1308_s25, 1 }
  0x18   : > { %p1844_p9 = por %p171_p6, %p59_p1  ;;  %p1437_p13 = scmp.lt.s32.totalorder %s1742_s23, 2 }
  0x19   : > { %s1849_s7 = scalar_select %p50_p7, %s1730_s20, %s52_s27  }
  0x1a   : > { %p1851_p11 = por %p177_p10, %p65_p3  ;;  %s1858_s9 = sand.u32 1, %s1730_s20  }
  0x1b   : > { %2149 = sst [smem:[#allocation22_spill]] %s1849_s7  ;;  %s1861_s10 = sshll.u32 %s1858_s9, 3 }
  0x1c   : > { %s1864_s11 = sshll.u32 %s1738_s22, 7  ;;  %p1868_p0 = pnand %p1437_p13, %p1832_p4 }
  0x1d   : > { %s244_s13 = sand.u32 1, %s1742_s23   ;;  %s2152_s1 = sld [smem:[#allocation23_spill]] }
  0x1e   : > { %s248_s17 = scalar_lea.vmem [#allocation5], %s1861_s10  ;;  %p1319_p1 = scmp.ge.s32.totalorder %s1742_s23, 1 }
  0x1f   : > { %s255_s25 = sshll.u32 %s248_s17, 4  ;;  %p297_p2 = scmp.lt.s32.totalorder %s1742_s23, 3  ;;  %s256_s25 = int_to_ptr.vmem [resolvable:$true] %s255_s25 }
  0x20   : > { %s1880_s27 = scalar_lea.sflag [#allocation6], %s244_s13  ;;  %p1514_p3 = pneg %p1868_p0 }
  0x21   : > { %s1525_s28 = scalar_lea.vmem %s256_s25, 128  ;;  %s1744_s29 = smov [#allocation5]  }
  0x22   : > { %p1526_p4 = scmp.ne.s32.totalorder %s256_s25, %s1525_s28  ;;  %s1530_s26 = sshll.u32 %s1744_s29, 4  ;;  %s1531_s26 = int_to_ptr.vmem [resolvable:$false] %s1530_s26 }
  0x23   : > { %s253_s16 = scalar_lea.hbm %s2152_s1, %s1864_s11  ;;  %s1532_s14 = scalar_lea.vmem %s1531_s26, 256 }
  0x24   : > { %p1528_p5 = pnand %p1526_p4, %p1514_p3  ;;  %p1533_p7 = scmp.lt.s32.totalorder %s256_s25, %s1531_s26 }
  0x25   : > { %p1534_p10 = scmp.lt.s32.totalorder %s1532_s14, %s1525_s28 }
  0x26   : > { %p1529_p6 = pneg %p1528_p5 }
  0x27   : > { %p1535_p13 = por %p1534_p10, %p1533_p7 }
  0x29   : > { %p1536_p12 = pnand %p1535_p13, %p1529_p6 }
  0x2b   : > { %1539 = shalt.err (!%p1536_p12)
}
  0x2c   : > { %1423 = dma.hbm_to_vmem [thread:$0]  (!%p1868_p0), %s253_s16, 128, %s256_s25, %s1880_s27  }
  0x2d   : > { %p1894_p4 = pnand %p1319_p1, %p297_p2  ;;  %s235_s17 = scalar_lea.hbm %s2130_s0, %s1864_s11 }
  0x2e   : > { %s229_s28 = scalar_lea.vmem [#allocation2], %s1861_s10  ;;  %s271_s22 = scalar_lea.hbm %s2132_s2, %s1864_s11 }
  0x2f   : > { %s237_s29 = sshll.u32 %s229_s28, 4  ;;  %s226_s7 = scalar_lea.sflag [#allocation3], %s1858_s9  ;;  %s238_s29 = int_to_ptr.vmem [resolvable:$true] %s237_s29 }
  0x30   : > { %s1553_s20 = scalar_lea.vmem %s238_s29, 128  ;;  %s1745_s16 = smov [#allocation2]  }
  0x31   : > { %p1554_p12 = scmp.ne.s32.totalorder %s238_s29, %s1553_s20  ;;  %s1558_s25 = sshll.u32 %s1745_s16, 4  ;;  %s1559_s25 = int_to_ptr.vmem [resolvable:$false] %s1558_s25 }
  0x32   : > { %s1560_s23 = scalar_lea.vmem %s1559_s25, 256  ;;  %p1561_p5 = scmp.lt.s32.totalorder %s238_s29, %s1559_s25 }
  0x33   : > { %p1556_p1 = pnand %p1554_p12, %p1514_p3  ;;  %p1562_p6 = scmp.lt.s32.totalorder %s1560_s23, %s1553_s20 }
  0x35   : > { %p1557_p2 = pneg %p1556_p1  ;;  %p1563_p7 = por %p1562_p6, %p1561_p5 }
  0x37   : > { %p1564_p10 = pnand %p1563_p7, %p1557_p2 }
  0x39   : > { %1567 = shalt.err (!%p1564_p10)
}
  0x3a   : > { %1420 = dma.hbm_to_vmem [thread:$0]  (!%p1868_p0), %s235_s17, 128, %s238_s29, %s226_s7  }
  0x3b   : > { %s266_s1 = scalar_lea.vmem [#allocation7], %s1861_s10  ;;  %s1746_s28 = smov [#allocation7]  }
  0x3c   : > { %s273_s26 = sshll.u32 %s266_s1, 4  ;;  %s1586_s14 = sshll.u32 %s1746_s28, 4  ;;  %s274_s26 = int_to_ptr.vmem [resolvable:$true] %s273_s26  ;;  %s1587_s14 = int_to_ptr.vmem [resolvable:$false] %s1586_s14 }
  0x3d   : > { %s1581_s15 = scalar_lea.vmem %s274_s26, 128  ;;  %s1588_s20 = scalar_lea.vmem %s1587_s14, 256 }
  0x3e   : > { %p1582_p13 = scmp.ne.s32.totalorder %s274_s26, %s1581_s15  ;;  %p1589_p2 = scmp.lt.s32.totalorder %s274_s26, %s1587_s14 }
  0x3f   : > { %p1590_p5 = scmp.lt.s32.totalorder %s1588_s20, %s1581_s15 }
  0x40   : > { %p1584_p12 = pnand %p1582_p13, %p1514_p3 }
  0x41   : > { %p1591_p6 = por %p1590_p5, %p1589_p2 }
  0x42   : > { %p1585_p1 = pneg %p1584_p12 }
  0x44   : > { %p1592_p7 = pnand %p1591_p6, %p1585_p1 }
  0x46   : > { %1595 = shalt.err (!%p1592_p7)
}
  0x47   : > { %1426 = dma.hbm_to_vmem [thread:$0]  (!%p1868_p0), %s271_s22, 128, %s274_s26, %s1880_s27  }
  0x48   : > { %s290_s16 = scalar_lea.hbm %s2133_s3, %s1864_s11  ;;  %s284_s25 = scalar_lea.vmem [#allocation8], %s1861_s10 }
  0x49   : > { %s292_s1 = sshll.u32 %s284_s25, 4  ;;  %s281_s15 = scalar_lea.sflag [#allocation9], %s1858_s9  ;;  %s293_s1 = int_to_ptr.vmem [resolvable:$true] %s292_s1 }
  0x4a   : > { %s1609_s28 = scalar_lea.vmem %s293_s1, 128  ;;  %s1747_s14 = smov [#allocation8]  }
  0x4b   : > { %p1610_p10 = scmp.ne.s32.totalorder %s293_s1, %s1609_s28  ;;  %s1614_s20 = sshll.u32 %s1747_s14, 4  ;;  %s1615_s20 = int_to_ptr.vmem [resolvable:$false] %s1614_s20 }
  0x4c   : > { %s1616_s23 = scalar_lea.vmem %s1615_s20, 256  ;;  %p1617_p1 = scmp.lt.s32.totalorder %s293_s1, %s1615_s20 }
  0x4d   : > { %p1612_p13 = pnand %p1610_p10, %p1514_p3  ;;  %p1618_p2 = scmp.lt.s32.totalorder %s1616_s23, %s1609_s28 }
  0x4f   : > { %p1613_p12 = pneg %p1612_p13  ;;  %p1619_p5 = por %p1618_p2, %p1617_p1 }
  0x51   : > { %p1620_p6 = pnand %p1619_p5, %p1613_p12 }
  0x53   : > { %1623 = shalt.err (!%p1620_p6)
}
  0x54   : > { %1429 = dma.hbm_to_vmem [thread:$0]  (!%p1868_p0), %s290_s16, 128, %s293_s1, %s281_s15  }
  0x55   : > { %301 = sbr.rel (%p1894_p4) target bundleno = 1495 (0x5d7), region = 36  ;;  %s1939_s22 = sand.u32 (!%p1894_p4), 1, %s1726_s19  }
  0x56   : > { %s1942_s9 = sshll.u32 (!%p1894_p4), %s1939_s22, 3  ;;  %s304_s10 = scalar_lea.sflag (!%p1894_p4), [#allocation3], %s1939_s22 }
  0x57   : > { %s307_s11 = scalar_lea.vmem (!%p1894_p4), [#allocation2], %s1942_s9 }
  0x5a   : > { %1701 = dma.done.wait (%p1840_p8), %s304_s10, 128  }
  0x5b   : > { %1703 = vsyncadd (%p1840_p8), %s304_s10, 4294967168  ;;  %s312_s12 = sand.u32 1, %s1820_s24   ;;  %s316_s13 = scalar_lea.vmem [#allocation5], %s1942_s9 }
  0x5c   : > { %s313_s27 = scalar_lea.sflag [#allocation6], %s312_s12 }
  0x5d   : > { %1705 = dma.done.wait (%p1840_p8), %s313_s27, 256  }
  0x5e   : > { %1707 = vsyncadd (%p1840_p8), %s313_s27, 4294967040  ;;  %s325_s26 = scalar_lea.vmem [#allocation7], %s1942_s9  ;;  %s331_s7 = scalar_lea.sflag [#allocation9], %s1939_s22 }
  0x5f   : > { %s334_s17 = scalar_lea.vmem [#allocation8], %s1942_s9 }
  0x60   : > { %1709 = dma.done.wait (%p1840_p8), %s331_s7, 128  }
  0x61   : > { %1711 = vsyncadd (%p1840_p8), %s331_s7, 4294967168  ;;  %v1748_v0 = vmov 0.0   ;;  %vm1749_vm0 = vmmov 0   ;;  %vm386_vm1 = vcmask 64512   ;;  %v384_v1 = vld [vmem:[%s316_s13] sm:$0xff]  ;;  %v382_v2 = vld [vmem:[%s307_s11] sm:$0xff] }
  0x62   : > { %1365 = vmatprep.subr.mxu0 %v1748_v0  ;;  %1367 = vmatprep.mubr.msk.f32.mxu0 %vm1749_vm0, %v1748_v0  ;;  %v383_v3 = vmul.f32 0.35355338, %v382_v2  ;;  %v1974_v4 = vld [vmem:[%s334_s17] sm:$0xff]  ;;  %s1750_s24 = smov 120   ;;  %s1751_s30 = smov 112   ;;  %v1986_v14 = vld [vmem:[%s325_s26] sm:$0xff] }
  0x63   : > { %1370 = vmatprep.subr.mxu1 %v1748_v0  ;;  %1372 = vmatprep.mubr.msk.f32.mxu1 %vm1749_vm0, %v1748_v0  ;;  %s1752_s29 = smov 104   ;;  %s1325_s16 = sshll.u32 %s1939_s22, 5 }
  0x64   : > { %1366 = vmatpush3.xpose.msk.msra.mxu0 %vm386_vm1, %v384_v1  ;;  %557 = vrot.lane.b32.xlu1 %v384_v1, %s1750_s24  ;;  %s1992_s25 = scalar_lea.vmem [#allocation11], %s1325_s16  ;;  %s2012_s1 = scalar_lea.vmem [#allocation10], %s1942_s9 }
  0x65   : > { %1380 = vmatprep.subr.mxu0 %v1748_v0  ;;  %1371 = vmatpush3.msra.mxu1 %v1986_v14  ;;  %s1753_s15 = smov 8   ;;  %s1754_s28 = smov 16  }
  0x66   : > { %1375 = vmatprep.subr.mxu1 %v1748_v0  ;;  %s1348_s14 = sshll.u32 %s1734_s21, 9  ;;  %s1123_s20 = sshll.u32 %s1992_s25, 4  ;;  %s2054_s20 = int_to_ptr.vmem [resolvable:$true] %s1123_s20 }
  0x67   : > { %1368 = vmatmul.mubr.msk.f32.vlgmr.msra.gmra.mxu0 %vm386_vm1, %v383_v3  ;;  %s2052_s10 = scalar_lea.hbm %s2135_s5, %s1348_s14  ;;  %s1095_s11 = scalar_lea.sflag [#allocation12], %s1939_s22 }
  0x68   : > { %1382 = vmatprep.mubr.msk.f32.mxu0 %vm1749_vm0, %v1748_v0  ;;  %554 = vrot.lane.b32.xlu1 %v383_v3, %s1750_s24  ;;  %s1624_s12 = scalar_lea.vmem %s2054_s20, 512  ;;  %s1755_s27 = smov [#allocation11]  }
  0x69   : > { %p1625_p8 = scmp.ne.s32.totalorder %s2054_s20, %s1624_s12  ;;  %s1628_s13 = sshll.u32 %s1755_s27, 4  ;;  %s1629_s13 = int_to_ptr.vmem [resolvable:$false] %s1628_s13 }
  0x6a   : > { %s1630_s26 = scalar_lea.vmem %s1629_s13, 1024  ;;  %p1631_p4 = scmp.lt.s32.totalorder %s2054_s20, %s1629_s13 }
  0x6b   : > { %p1626_p0 = pnand %p1625_p8, %p1844_p9  ;;  %p1632_p7 = scmp.lt.s32.totalorder %s1630_s26, %s1624_s12 }
  0x6c   : > { %734 = vrot.lane.b32.xlu1 %v383_v3, %s1751_s30 }
  0x6d   : > { %p1627_p3 = pneg %p1626_p0  ;;  %p1633_p10 = por %p1632_p7, %p1631_p4 }
  0x6f   : > { %p1634_p13 = pnand %p1633_p10, %p1627_p3 }
  0x70   : > { %917 = vrot.lane.b32.xlu1 %v384_v1, %s1752_s29 }
  0x74   : > { %914 = vrot.lane.b32.xlu1 %v383_v3, %s1752_s29 }
  0xd6   : > { %v558_v16 = vpop.permute.xlu1 %557 }
  0xda   : > { %v555_v17 = vpop.permute.xlu1 %554 }
  0xde   : > { %v735_v19 = vpop.permute.xlu1 %734 }
  0xe2   : > { %v918_v22 = vpop.permute.xlu1 %917 }
  0xe6   : > { %v915_v23 = vpop.permute.xlu1 %914 }
 0x127   : > { %v459_v5 = vpop.f32.mrf.mxu0 }
 0x128   : > { %v460_v6 = vadd.f32 %v459_v5, %v1974_v4 }
 0x129   : > { %v1369_v7 = vpop.f32.mrf.mxu0 }
 0x12a   : > { %v463_v8 = vsel %vm386_vm1, %v460_v6, -inf }
 0x12b   : > { %464 = vmax.xlane.f32.xlu0 %v463_v8 }
 0x1b4   : > { %v465_v9 = vpop.xlane.xlu0 %464 }
 0x1b5   : > { %v466_v10 = vsub.f32 %v460_v6, %v465_v9 }
 0x1b7   : > { %v467_v11 = vmul.f32 1.442695, %v466_v10 }
 0x1b9   : > { %1496 = vpow2.f32 %v467_v11 }
 0x1c6   : > { %v1497_v12 = vpop.eup %1496 }
 0x1c7   : > { %v469_v13 = vsel %vm386_vm1, %v1497_v12, 0.0 }
 0x1c8   : > { %470 = vadd.xlane.f32.xlu0 %v469_v13 }
 0x1de   : > { %737 = vrot.lane.b32.xlu0 %v384_v1, %s1751_s30 }
 0x251   : > { %v471_v15 = vpop.xlane.xlu0 %470 }
 0x252   : > { %1498 = vrcp.f32 %v471_v15 }
 0x255   : > { %v738_v21 = vpop.permute.xlu0 %737 }
 0x25f   : > { %v1499_v18 = vpop.eup %1498 }
 0x260   : > { %v473_v20 = vmul.f32 %v1499_v18, %v1497_v12 }
 0x262   : > { %474 = vst.msk [vmem:[%s1992_s25] sm:$0xff] %vm386_vm1, %v473_v20  ;;  %1373 = vmatmul.mubr.msk.f32.vlgmr.msra.gmra.mxu1 %vm386_vm1, %v473_v20 }
 0x263   : > { %1376 = vmatpush3.xpose.msk.msra.mxu1 %vm386_vm1, %v558_v16  ;;  %1377 = vmatprep.mubr.msk.f32.mxu1 %vm1749_vm0, %v1748_v0 }
 0x264   : > { %1385 = vmatprep.subr.mxu1 %v1748_v0 }
 0x266   : > { %1378 = vmatmul.mubr.msk.f32.vlgmr.msra.gmra.mxu1 %vm386_vm1, %v555_v17 }
 0x267   : > { %1386 = vmatpush3.xpose.msk.msra.mxu1 %vm386_vm1, %v738_v21  ;;  %1387 = vmatprep.mubr.msk.f32.mxu1 %vm1749_vm0, %v1748_v0 }
 0x268   : > { %1395 = vmatprep.subr.mxu1 %v1748_v0 }
 0x26a   : > { %1388 = vmatmul.mubr.msk.f32.vlgmr.msra.gmra.mxu1 %vm386_vm1, %v735_v19 }
 0x26b   : > { %1396 = vmatpush3.xpose.msk.msra.mxu1 %vm386_vm1, %v918_v22  ;;  %1397 = vmatprep.mubr.msk.f32.mxu1 %vm1749_vm0, %v1748_v0 }
 0x26e   : > { %1398 = vmatmul.mubr.msk.f32.vlgmr.msra.gmra.mxu1 %vm386_vm1, %v915_v23 }
 0x322   : > { %v544_v24 = vpop.f32.mrf.mxu1 }
 0x323   : > { %548 = vst.msk [vmem:[%s2012_s1] sm:$0xff] %vm386_vm1, %v544_v24 }
 0x324   : > { %v1374_v25 = vpop.f32.mrf.mxu1 }
 0x326   : > { %v629_v26 = vpop.f32.mrf.mxu1 }
 0x327   : > { %v630_v27 = vadd.f32 %v629_v26, %v1974_v4 }
 0x328   : > { %v1379_v28 = vpop.f32.mrf.mxu1 }
 0x329   : > { %v633_v29 = vsel %vm386_vm1, %v630_v27, -inf }
 0x32a   : > { %634 = vmax.xlane.f32.xlu1 %v633_v29  ;;  %v809_v30 = vpop.f32.mrf.mxu1 }
 0x32b   : > { %v810_v31 = vadd.f32 %v809_v30, %v1974_v4 }
 0x32c   : > { %v1389_v32 = vpop.f32.mrf.mxu1 }
 0x32d   : > { %v813_v33 = vsel %vm386_vm1, %v810_v31, -inf }
 0x32e   : > { %814 = vmax.xlane.f32.xlu0 %v813_v33  ;;  %v989_v34 = vpop.f32.mrf.mxu1 }
 0x32f   : > { %v990_v35 = vadd.f32 %v989_v34, %v1974_v4 }
 0x330   : > { %v1399_v36 = vpop.f32.mrf.mxu1 }
 0x331   : > { %v993_v37 = vsel %vm386_vm1, %v990_v35, -inf }
 0x332   : > { %994 = vmax.xlane.f32.xlu1 %v993_v37 }
 0x3b3   : > { %v635_v38 = vpop.xlane.xlu1 %634 }
 0x3b4   : > { %v636_v39 = vsub.f32 %v630_v27, %v635_v38 }
 0x3b6   : > { %v637_v40 = vmul.f32 1.442695, %v636_v39 }
 0x3b7   : > { %v815_v41 = vpop.xlane.xlu0 %814 }
 0x3b8   : > { %1500 = vpow2.f32 %v637_v40  ;;  %v816_v42 = vsub.f32 %v810_v31, %v815_v41 }
 0x3ba   : > { %v817_v43 = vmul.f32 1.442695, %v816_v42 }
 0x3bb   : > { %v995_v48 = vpop.xlane.xlu1 %994 }
 0x3bc   : > { %1502 = vpow2.f32 %v817_v43  ;;  %v996_v49 = vsub.f32 %v990_v35, %v995_v48 }
 0x3be   : > { %v997_v50 = vmul.f32 1.442695, %v996_v49 }
 0x3c0   : > { %1504 = vpow2.f32 %v997_v50 }
 0x3c5   : > { %v1501_v44 = vpop.eup %1500 }
 0x3c6   : > { %v639_v45 = vsel %vm386_vm1, %v1501_v44, 0.0 }
 0x3c7   : > { %640 = vadd.xlane.f32.xlu1 %v639_v45 }
 0x3c9   : > { %v1503_v46 = vpop.eup %1502 }
 0x3ca   : > { %v819_v47 = vsel %vm386_vm1, %v1503_v46, 0.0 }
 0x3cb   : > { %820 = vadd.xlane.f32.xlu0 %v819_v47 }
 0x3cd   : > { %v1505_v51 = vpop.eup %1504 }
 0x3ce   : > { %v999_v52 = vsel %vm386_vm1, %v1505_v51, 0.0 }
 0x3d8   : > { %827 = vrot.lane.b32.xlu1 %v1986_v14, %s1751_s30 }
 0x3e1   : > { %647 = vrot.lane.b32.xlu0 %v1986_v14, %s1750_s24 }
 0x3fc   : > { %1000 = vadd.xlane.f32.xlu1 %v999_v52 }
 0x40d   : > { %1007 = vrot.lane.b32.xlu1 %v1986_v14, %s1752_s29 }
 0x450   : > { %v641_v53 = vpop.xlane.xlu1 %640 }
 0x451   : > { %1506 = vrcp.f32 %v641_v53 }
 0x454   : > { %v821_v54 = vpop.xlane.xlu0 %820  ;;  %v828_v58 = vpop.permute.xlu1 %827 }
 0x455   : > { %1508 = vrcp.f32 %v821_v54 }
 0x458   : > { %v648_v55 = vpop.permute.xlu0 %647 }
 0x459   : > { %1381 = vmatpush3.msra.mxu0 %v648_v55 }
 0x45a   : > { %1390 = vmatprep.subr.mxu0 %v1748_v0 }
 0x45e   : > { %v1507_v56 = vpop.eup %1506 }
 0x45f   : > { %v643_v57 = vmul.f32 %v1507_v56, %v1501_v44 }
 0x461   : > { %1331 = vst.msk [vmem:[%s1992_s25 + $0x8] sm:$0xff] %vm386_vm1, %v643_v57  ;;  %1383 = vmatmul.mubr.msk.f32.vlgmr.msra.gmra.mxu0 %vm386_vm1, %v643_v57 }
 0x462   : > { %v1509_v59 = vpop.eup %1508  ;;  %1391 = vmatpush3.msra.mxu0 %v828_v58  ;;  %1392 = vmatprep.mubr.msk.f32.mxu0 %vm1749_vm0, %v1748_v0 }
 0x463   : > { %v823_v60 = vmul.f32 %v1509_v59, %v1503_v46  ;;  %1400 = vmatprep.subr.mxu0 %v1748_v0 }
 0x465   : > { %1335 = vst.msk [vmem:[%s1992_s25 + $0x10] sm:$0xff] %vm386_vm1, %v823_v60  ;;  %1393 = vmatmul.mubr.msk.f32.vlgmr.msra.gmra.mxu0 %vm386_vm1, %v823_v60 }
 0x466   : > { %1402 = vmatprep.mubr.msk.f32.mxu0 %vm1749_vm0, %v1748_v0 }
 0x485   : > { %v1001_v61 = vpop.xlane.xlu1 %1000 }
 0x486   : > { %1510 = vrcp.f32 %v1001_v61 }
 0x489   : > { %v1008_v62 = vpop.permute.xlu1 %1007 }
 0x48a   : > { %1401 = vmatpush3.msra.mxu0 %v1008_v62 }
 0x493   : > { %v1511_v63 = vpop.eup %1510 }
 0x494   : > { %v1003_v1 = vmul.f32 %v1511_v63, %v1505_v51 }
 0x496   : > { %1339 = vst.msk [vmem:[%s1992_s25 + $0x18] sm:$0xff] %vm386_vm1, %v1003_v1  ;;  %1403 = vmatmul.mubr.msk.f32.vlgmr.msra.gmra.mxu0 %vm386_vm1, %v1003_v1 }
 0x521   : > { %v719_v2 = vpop.f32.mrf.mxu0 }
 0x522   : > { %724 = vrot.lane.b32.xlu0 %v719_v2, %s1753_s15 }
 0x523   : > { %v1384_v3 = vpop.f32.mrf.mxu0 }
 0x525   : > { %v899_v0 = vpop.f32.mrf.mxu0 }
 0x526   : > { %904 = vrot.lane.b32.xlu1 %v899_v0, %s1754_s28 }
 0x527   : > { %v1394_v4 = vpop.f32.mrf.mxu0 }
 0x528   : > { %1637 = shalt.err (!%p1634_p13)
}
 0x529   : > { %s1638_s7 = scalar_lea.hbm %s2052_s10, 512  ;;  %s1642_s30 = scalar_lea.hbm %s2135_s5, 1024 }
 0x52a   : > { %p1639_p12 = scmp.ne.s32.totalorder %s2052_s10, %s1638_s7  ;;  %p1643_p5 = scmp.lt.s32.totalorder %s2052_s10, %s2135_s5 }
 0x52b   : > { %p1644_p6 = scmp.lt.s32.totalorder %s1642_s30, %s1638_s7 }
 0x52c   : > { %p1640_p1 = pnand %p1639_p12, %p1844_p9 }
 0x52d   : > { %p1645_p8 = por %p1644_p6, %p1643_p5 }
 0x52e   : > { %p1641_p2 = pneg %p1640_p1 }
 0x530   : > { %p1646_p0 = pnand %p1645_p8, %p1641_p2 }
 0x532   : > { %1649 = shalt.err (!%p1646_p0)
}
 0x533   : > { %s1756_s25 = smov 128   ;;  %s1757_s28 = smov 24   ;;  %vm727_vm2 = vcmask 130112   ;;  %vm907_vm3 = vcmask 195712   ;;  %vm1087_vm4 = vcmask 261312  }
 0x534   : > { %1414 = dma.vmem_to_hbm [thread:$0]  (%p1844_p9), %s2054_s20, 512, %s2052_s10, %s1095_s11, %s1756_s25, %s1756_s25, %s1753_s15  }
 0x535   : > { %s1343_s14 = sshll.u32 %s1734_s21, 7  ;;  %s1109_s23 = sshll.u32 %s2012_s1, 4  ;;  %s1110_s23 = int_to_ptr.vmem [resolvable:$true] %s1109_s23 }
 0x536   : > { %s2087_s15 = scalar_lea.hbm %s2134_s4, %s1343_s14  ;;  %s1090_s20 = scalar_lea.sflag [#allocation4], %s1939_s22 }
 0x537   : > { %s1650_s10 = scalar_lea.vmem %s1110_s23, 128  ;;  %s1758_s11 = smov [#allocation10]  }
 0x538   : > { %p1651_p3 = scmp.ne.s32.totalorder %s1110_s23, %s1650_s10  ;;  %s1654_s27 = sshll.u32 %s1758_s11, 4  ;;  %s1655_s27 = int_to_ptr.vmem [resolvable:$false] %s1654_s27 }
 0x539   : > { %s1656_s21 = scalar_lea.vmem %s1655_s27, 256  ;;  %p1657_p10 = scmp.lt.s32.totalorder %s1110_s23, %s1655_s27 }
 0x53a   : > { %p1652_p4 = pnand %p1651_p3, %p1844_p9  ;;  %p1658_p13 = scmp.lt.s32.totalorder %s1656_s21, %s1650_s10 }
 0x53c   : > { %p1653_p7 = pneg %p1652_p4  ;;  %p1659_p12 = por %p1658_p13, %p1657_p10 }
 0x53e   : > { %p1660_p1 = pnand %p1659_p12, %p1653_p7 }
 0x556   : > { %v1079_v5 = vpop.f32.mrf.mxu0 }
 0x557   : > { %1084 = vrot.lane.b32.xlu0 %v1079_v5, %s1757_s28 }
 0x558   : > { %v1404_v6 = vpop.f32.mrf.mxu0 }
 0x594   : > { %v725_v7 = vpop.permute.xlu0 %724 }
 0x595   : > { %728 = vst.msk [vmem:[%s2012_s1] sm:$0xff] %vm727_vm2, %v725_v7 }
 0x598   : > { %v905_v8 = vpop.permute.xlu1 %904 }
 0x599   : > { %908 = vst.msk [vmem:[%s2012_s1] sm:$0xff] %vm907_vm3, %v905_v8 }
 0x5c9   : > { %v1085_v9 = vpop.permute.xlu0 %1084 }
 0x5ca   : > { %1088 = vst.msk [vmem:[%s2012_s1] sm:$0xff] %vm1087_vm4, %v1085_v9 }
 0x5cb   : > { %1663 = shalt.err (!%p1660_p1)
}
 0x5cc   : > { %s1664_s1 = scalar_lea.hbm %s2087_s15, 128  ;;  %s1668_s26 = scalar_lea.hbm %s2134_s4, 256 }
 0x5cd   : > { %p1665_p2 = scmp.ne.s32.totalorder %s2087_s15, %s1664_s1  ;;  %p1669_p8 = scmp.lt.s32.totalorder %s2087_s15, %s2134_s4 }
 0x5ce   : > { %p1670_p0 = scmp.lt.s32.totalorder %s1668_s26, %s1664_s1 }
 0x5cf   : > { %p1666_p5 = pnand %p1665_p2, %p1844_p9 }
 0x5d0   : > { %p1671_p3 = por %p1670_p0, %p1669_p8 }
 0x5d1   : > { %p1667_p6 = pneg %p1666_p5 }
 0x5d3   : > { %p1672_p4 = pnand %p1671_p3, %p1667_p6 }
 0x5d5   : > { %1675 = shalt.err (!%p1672_p4)
}
 0x5d6   : > { %1413 = dma.vmem_to_hbm [thread:$0]  (%p1844_p9), %s1110_s23, 128, %s2087_s15, %s1090_s20  }
 0x5d7 PF: > { %s2154_s24 = sld [smem:[#allocation20_spill]]  ;;  %s1138_s30 = sand.u32 1, %s1722_s18  }
 0x5d8   : > { %s1139_s29 = scalar_lea.sflag [#allocation4], %s1138_s30 }
 0x5dd   : > { %p2155_p7 = scmp.ge.s32.totalorder %s2154_s24, 2 }
 0x5df   : > { %p1431_p10 = pnand %p2155_p7, %p1851_p11 }
 0x5e1   : > { %p1432_p13 = pneg %p1431_p10 }
 0x5e3   : > { %1713 = dma.done.wait (%p1432_p13), %s1139_s29, 128  }
 0x5e4   : > { %1715 = vsyncadd (%p1432_p13), %s1139_s29, 4294967168  ;;  %s1148_s16 = scalar_lea.sflag [#allocation12], %s1138_s30 }
 0x5e5   : > { %1717 = dma.done.wait (%p1432_p13), %s1148_s16, 512  }
 0x5e6   : > { %1719 = vsyncadd (%p1432_p13), %s1148_s16, 4294966784  ;;  %s31_s23 = sadd.s32 1, %s2154_s24   ;;  %s2156_s6 = sld [smem:[#allocation18_spill]] }
 0x5e7   : > { %p28_p12 = scmp.ge.s32.totalorder %s31_s23, 4   ;;  %s2157_s20 = sld [smem:[#allocation22_spill]] }
 0x5e8   : > { %s2158_s21 = sld [smem:[#allocation19_spill]]  ;;  %s2160_s18 = smov %s1726_s19 }
 0x5e9   : > { %s2159_s22 = sld [smem:[#allocation21_spill]]  ;;  %30 = sbr.rel (!%p28_p12) target bundleno = 14 (0xe), region = 138 }
 0x5ec   : > { %s2161_s19 = smov %s2156_s6 }
 0x5ee   :  { %1153 = vsyncpa [#allocation3], 1 }
 0x5ef   :  { %1155 = vsyncpa [#allocation3 + $0x1], 1 }
 0x5f0   :  { %1156 = vsyncpa [#allocation6], 1 }
 0x5f1   :  { %1158 = vsyncpa [#allocation6 + $0x1], 1 }
 0x5f2   :  { %1159 = vsyncpa [#allocation9], 1 }
 0x5f3   :  { %1161 = vsyncpa [#allocation9 + $0x1], 1 }
 0x5f4   :  { %1162 = vsyncpa [#allocation4], 1 }
 0x5f5   :  { %1164 = vsyncpa [#allocation4 + $0x1], 1 }
 0x5f6   :  { %1165 = vsyncpa [#allocation12], 1 }
 0x5f7   :  { %1167 = vsyncpa [#allocation12 + $0x1], 1 }

</bundles_post_ra>
